<compile_context>
chip_gen: v7x
topology: tpu7x:2x2x1
jax: 0.10.0
libtpu: 0.0.40
codegen_flags: <defaults>
</compile_context>

<pallas_src>
import functools

import jax
import jax.numpy as jnp
from jax import lax
from jax.experimental import pallas as pl
from jax.experimental.pallas import tpu as pltpu

_LANES = 128
_SUB = 8


def _cdiv(a, b):
    return -(-a // b)


def _round_up(v, m):
    return ((v + m - 1) // m) * m


def _y_partial_moments_kernel(shift_ref, y_ref, sum_ref, sq_ref, *,
                              tile_rows, tiles_per_core, n_elems, n_full_rows):
    """Accumulates per-core partial sums of (y - shift) and (y - shift)**2.

    Outputs are (1, 8, 128) f32 blocks (one per parallel slot); the cross-
    sublane / cross-lane reduction is deferred to the wrapper.
    """
    core = pl.program_id(0)
    t = pl.program_id(1)

    @pl.when(t == 0)
    def _init():
        sum_ref[...] = jnp.zeros_like(sum_ref)
        sq_ref[...] = jnp.zeros_like(sq_ref)

    linear_tile = core * tiles_per_core + t      # un-clamped logical tile id
    row0 = linear_tile * tile_rows               # first global row of this tile
    shift = shift_ref[0]

    def _accumulate(ys):
        # ys: (tile_rows, 128) f32, shifted (and masked if needed).
        if tile_rows % _SUB == 0:
            # vreg-aligned: pure vadds over a (tiles//8, 8, 128) view,
            # no per-step sublane reduce.
            ysr = ys.reshape(tile_rows // _SUB, _SUB, _LANES)
            sum_ref[...] += jnp.sum(ysr, axis=0)[None]
            sq_ref[...] += jnp.sum(ysr * ysr, axis=0)[None]
        else:
            # tiny single-tile case (rows not a multiple of 8): plain reduce.
            sum_ref[:, 0:1, :] += jnp.sum(ys, axis=0, keepdims=True)[None]
            sq_ref[:, 0:1, :] += jnp.sum(ys * ys, axis=0, keepdims=True)[None]

    # A tile is "fully valid" iff every one of its rows is a complete data row.
    fully_valid = (row0 + tile_rows) <= n_full_rows

    @pl.when(fully_valid)
    def _fast():                                  # steady state: no mask work
        y = y_ref[...].astype(jnp.float32)
        _accumulate(y - shift)

    @pl.when(jnp.logical_not(fully_valid))
    def _boundary():                              # last tile / clamped overhang
        y = y_ref[...].astype(jnp.float32)
        rid = lax.broadcasted_iota(jnp.int32, (tile_rows, _LANES), 0)
        lid = lax.broadcasted_iota(jnp.int32, (tile_rows, _LANES), 1)
        eid = (row0 + rid) * _LANES + lid         # global element index
        _accumulate(jnp.where(eid < n_elems, y - shift, 0.0))


def pce_coeff_loss(c_coeff, y_coeff, *, max_tile_rows=4096, num_parallel=2):
    """Forward pass of CoefficientPCELoss_coeff_batch -> scalar f32 loss.

    max_tile_rows: 128-lane rows per streamed y tile.  4096 (2 MiB f32) sits on
      the v6e roofline plateau; raise to 8192-16384 on v7x, 2048-4096 suffices
      on v5e.
    num_parallel: size of the leading "parallel" grid axis; 2 lets v7x's two
      TensorCores each stream half of y (harmless serial loop on v5e/v6e).
    """
    n = int(y_coeff.size)

    # ---- lane-dense view of y (copy-free when n % 128 == 0) -----------------
    y_flat = jnp.reshape(y_coeff, (-1,))
    shift = y_flat[:1].astype(jnp.float32)        # variance shift (stability)
    rem = n % _LANES
    if rem:
        y_flat = jnp.pad(y_flat, (0, _LANES - rem))
    y2d = jnp.reshape(y_flat, (-1, _LANES))
    rows = y2d.shape[0]

    # ---- balanced tiling (never pad rows up to a tile multiple) -------------
    mtr = max(16, (max_tile_rows // 16) * 16)     # 16-row aligned (bf16 friendly)
    if rows <= mtr:
        tile_rows, num_tiles = rows, 1            # full-dim block: always legal
    else:
        nt0 = _cdiv(rows, mtr)
        tile_rows = min(mtr, _round_up(_cdiv(rows, nt0), 16))
        num_tiles = _cdiv(rows, tile_rows)
    num_par = max(1, min(num_parallel, num_tiles))
    tiles_per_core = _cdiv(num_tiles, num_par)

    kernel = functools.partial(
        _y_partial_moments_kernel,
        tile_rows=tile_rows, tiles_per_core=tiles_per_core,
        n_elems=n, n_full_rows=n // _LANES)

    def y_map(c, t):
        # Clamp so any grid point past the last logical tile re-reads the
        # boundary block (its contribution is masked to zero in the kernel)
        # instead of issuing a fully out-of-bounds DMA.
        return (jnp.minimum(c * tiles_per_core + t, num_tiles - 1), 0)

    part_shape = jax.ShapeDtypeStruct((num_par, _SUB, _LANES), jnp.float32)

    sum_parts, sq_parts = pl.pallas_call(
        kernel,
        out_shape=(part_shape, part_shape),
        grid=(num_par, tiles_per_core),
        in_specs=[
            pl.BlockSpec(memory_space=pltpu.MemorySpace.SMEM),   # shift (1,) f32
            pl.BlockSpec((tile_rows, _LANES), y_map),            # streamed y tiles
        ],
        out_specs=(
            pl.BlockSpec((1, _SUB, _LANES), lambda c, t: (c, 0, 0)),
            pl.BlockSpec((1, _SUB, _LANES), lambda c, t: (c, 0, 0)),
        ),
        compiler_params=pltpu.CompilerParams(
            dimension_semantics=("parallel", "arbitrary"),
            vmem_limit_bytes=32 * 1024 * 1024,
        ),
        cost_estimate=pl.CostEstimate(
            flops=5 * n,
            transcendentals=0,
            bytes_accessed=n * y2d.dtype.itemsize
            + 2 * num_par * _SUB * _LANES * 4,
        ),
    )(shift, y2d)

    # ---- tiny finalize in plain JAX (O(B*K) + a few scalars) ----------------
    s = jnp.sum(sum_parts)
    ss = jnp.sum(sq_parts)
    nf = jnp.float32(n)
    y_mean = shift[0] + s / nf
    # NOTE: n == 1 yields inf/nan here, matching torch's unbiased variance of a
    # single element.
    y_var = (ss - s * s / nf) / jnp.float32(n - 1)

    c_mean = jnp.mean(c_coeff.astype(jnp.float32), axis=0)
    inter_sq = jnp.sum(c_mean[1:-1] ** 2)         # empty slice -> 0, as in torch
    return jnp.abs(c_mean[0] - y_mean) + jnp.abs(inter_sq - y_var)


def _ref_loss(c_coeff, y_coeff):
    c_mean = c_coeff.astype(jnp.float32).mean(axis=0)
    y = y_coeff.astype(jnp.float32)
    return (jnp.abs(c_mean[0] - y.mean())
            + jnp.abs(jnp.sum(c_mean[1:-1] ** 2) - jnp.var(y, ddof=1)))


def _check(name, got, want, rtol=1e-4, atol=1e-4):
    ok = bool(jnp.allclose(got, want, rtol=rtol, atol=atol))
    assert ok, f"{name}: got {float(got)}, want {float(want)}"


if __name__ == "__main__":
    key = jax.random.PRNGKey(0)
    k1, k2, k3, k4, k5, k6 = jax.random.split(key, 6)

    # 1) Small shapes consistent with the module (single tile, n % 128 == 0).
    c_small = jax.random.normal(k1, (8, 32), dtype=jnp.float32)
    y_small = jax.random.normal(k2, (8, 16), dtype=jnp.float32)
    out = pce_coeff_loss(c_small, y_small)
    jax.block_until_ready(out)
    _check("small", out, _ref_loss(c_small, y_small))

    # 2) Unaligned y (n % 128 != 0): multi-tile, boundary mask, and one clamped
    #    duplicate grid point (3 tiles spread over a 2-wide parallel axis).
    c_big = jax.random.normal(k3, (16, 40), dtype=jnp.float32)
    y_big = jax.random.normal(k4, (40, 333), dtype=jnp.float32)
    out_big = pce_coeff_loss(c_big, y_big, max_tile_rows=48)
    jax.block_until_ready(out_big)
    _check("unaligned", out_big, _ref_loss(c_big, y_big))

    # 3) Copy-free multi-tile streaming path (n % 128 == 0, several full tiles).
    y_stream = jax.random.normal(k5, (256, 512), dtype=jnp.float32)
    out_stream = pce_coeff_loss(c_big, y_stream, max_tile_rows=256)
    jax.block_until_ready(out_stream)
    _check("stream", out_stream, _ref_loss(c_big, y_stream))

    # 4) K=2 edge case: c_mean[1:-1] is empty -> quadratic term is 0.
    c_edge = jax.random.normal(k6, (4, 2), dtype=jnp.float32)
    out_edge = pce_coeff_loss(c_edge, y_small)
    jax.block_until_ready(out_edge)
    _check("k2-edge", out_edge, _ref_loss(c_edge, y_small))

    print("KERNEL_OK")
</pallas_src>

<mosaic_0001>
module attributes {stable_mosaic.version = 11 : i64} {
  func.func @_y_partial_moments_kernel(%arg0: i32, %arg1: i32, %arg2: memref<1xf32, #tpu.memory_space<smem>>, %arg3: memref<1x128xf32, #tpu.memory_space<vmem>>, %arg4: memref<1x8x128xf32, #tpu.memory_space<vmem>>, %arg5: memref<1x8x128xf32, #tpu.memory_space<vmem>>) attributes {dimension_semantics = [#tpu.dimension_semantics<parallel>, #tpu.dimension_semantics<arbitrary>], iteration_bounds = array<i64: 1, 1>, scalar_prefetch = 0 : i64, scratch_operands = 0 : i64, tpu.core_type = #tpu.core_type<tc>, window_params = [{transform_indices = @transform_0, window_bounds = array<i64: 1>}, {transform_indices = @transform_1, window_bounds = array<i64: 1, 128>}, {transform_indices = @transform_2, window_bounds = array<i64: 1, 8, 128>}, {transform_indices = @transform_3, window_bounds = array<i64: 1, 8, 128>}]} {
    %c0_i32 = arith.constant 0 : i32
    %0 = arith.cmpi eq, %arg1, %c0_i32 : i32
    %1 = arith.extui %0 : i1 to i32
    %c0_i32_0 = arith.constant 0 : i32
    %2 = arith.cmpi ne, %1, %c0_i32_0 : i32
    scf.if %2 {
      %cst = arith.constant 0.000000e+00 : f32
      %14 = vector.broadcast %cst : f32 to vector<1x8x128xf32>
      %c0_6 = arith.constant 0 : index
      %c0_7 = arith.constant 0 : index
      %c0_8 = arith.constant 0 : index
      %15 = vector.load %arg4[%c0_6, %c0_7, %c0_8] : memref<1x8x128xf32, #tpu.memory_space<vmem>>, vector<1x8x128xf32>
      tpu.vector_store %arg4[%c0_6, %c0_7, %c0_8], %14 {strides = array<i32>} : memref<1x8x128xf32, #tpu.memory_space<vmem>>, vector<1x8x128xf32>,
      %cst_9 = arith.constant 0.000000e+00 : f32
      %16 = vector.broadcast %cst_9 : f32 to vector<1x8x128xf32>
      %c0_10 = arith.constant 0 : index
      %c0_11 = arith.constant 0 : index
      %c0_12 = arith.constant 0 : index
      %17 = vector.load %arg5[%c0_10, %c0_11, %c0_12] : memref<1x8x128xf32, #tpu.memory_space<vmem>>, vector<1x8x128xf32>
      tpu.vector_store %arg5[%c0_10, %c0_11, %c0_12], %16 {strides = array<i32>} : memref<1x8x128xf32, #tpu.memory_space<vmem>>, vector<1x8x128xf32>,
    } else {
    }
    %c1_i32 = arith.constant 1 : i32
    %3 = arith.muli %arg0, %c1_i32 : i32
    %4 = arith.addi %3, %arg1 : i32
    %c1_i32_1 = arith.constant 1 : i32
    %5 = arith.muli %4, %c1_i32_1 : i32
    %c0 = arith.constant 0 : index
    %6 = memref.load %arg2[%c0] : memref<1xf32, #tpu.memory_space<smem>>
    %c1_i32_2 = arith.constant 1 : i32
    %7 = arith.addi %5, %c1_i32_2 : i32
    %c1_i32_3 = arith.constant 1 : i32
    %8 = arith.cmpi sle, %7, %c1_i32_3 : i32
    %9 = arith.extui %8 : i1 to i32
    %c0_i32_4 = arith.constant 0 : i32
    %10 = arith.cmpi ne, %9, %c0_i32_4 : i32
    scf.if %10 {
      %c0_6 = arith.constant 0 : index
      %c0_7 = arith.constant 0 : index
      %14 = vector.load %arg3[%c0_6, %c0_7] : memref<1x128xf32, #tpu.memory_space<vmem>>, vector<1x128xf32>
      %15 = vector.broadcast %6 : f32 to vector<1x128xf32>
      %16 = arith.subf %14, %15 : vector<1x128xf32>
      %c0_8 = arith.constant 0 : index
      %c0_9 = arith.constant 0 : index
      %c0_10 = arith.constant 0 : index
      %17 = vector.load %arg4[%c0_8, %c0_9, %c0_10] : memref<1x8x128xf32, #tpu.memory_space<vmem>>, vector<1x1x128xf32>
      %cst = arith.constant dense<0.000000e+00> : vector<128xf32>
      %18 = vector.multi_reduction <add>, %16, %cst [0] : vector<1x128xf32> to vector<128xf32>
      %19 = vector.shape_cast %18 : vector<128xf32> to vector<1x128xf32>
      %20 = vector.shape_cast %19 : vector<1x128xf32> to vector<1x1x128xf32>
      %21 = arith.addf %17, %20 : vector<1x1x128xf32>
      %c0_11 = arith.constant 0 : index
      %c0_12 = arith.constant 0 : index
      %c0_13 = arith.constant 0 : index
      %22 = vector.load %arg4[%c0_11, %c0_12, %c0_13] : memref<1x8x128xf32, #tpu.memory_space<vmem>>, vector<1x1x128xf32>
      tpu.vector_store %arg4[%c0_11, %c0_12, %c0_13], %21 {strides = array<i32>} : memref<1x8x128xf32, #tpu.memory_space<vmem>>, vector<1x1x128xf32>,
      %c0_14 = arith.constant 0 : index
      %c0_15 = arith.constant 0 : index
      %c0_16 = arith.constant 0 : index
      %23 = vector.load %arg5[%c0_14, %c0_15, %c0_16] : memref<1x8x128xf32, #tpu.memory_space<vmem>>, vector<1x1x128xf32>
      %24 = arith.mulf %16, %16 : vector<1x128xf32>
      %cst_17 = arith.constant dense<0.000000e+00> : vector<128xf32>
      %25 = vector.multi_reduction <add>, %24, %cst_17 [0] : vector<1x128xf32> to vector<128xf32>
      %26 = vector.shape_cast %25 : vector<128xf32> to vector<1x128xf32>
      %27 = vector.shape_cast %26 : vector<1x128xf32> to vector<1x1x128xf32>
      %28 = arith.addf %23, %27 : vector<1x1x128xf32>
      %c0_18 = arith.constant 0 : index
      %c0_19 = arith.constant 0 : index
      %c0_20 = arith.constant 0 : index
      %29 = vector.load %arg5[%c0_18, %c0_19, %c0_20] : memref<1x8x128xf32, #tpu.memory_space<vmem>>, vector<1x1x128xf32>
      tpu.vector_store %arg5[%c0_18, %c0_19, %c0_20], %28 {strides = array<i32>} : memref<1x8x128xf32, #tpu.memory_space<vmem>>, vector<1x1x128xf32>,
    } else {
    }
    %true = arith.constant true
    %11 = arith.xori %8, %true : i1
    %12 = arith.extui %11 : i1 to i32
    %c0_i32_5 = arith.constant 0 : i32
    %13 = arith.cmpi ne, %12, %c0_i32_5 : i32
    scf.if %13 {
      %c0_6 = arith.constant 0 : index
      %c0_7 = arith.constant 0 : index
      %14 = vector.load %arg3[%c0_6, %c0_7] : memref<1x128xf32, #tpu.memory_space<vmem>>, vector<1x128xf32>
      %15 = tpu.iota {dimensions = array<i32: 0>} : vector<1x128xi32>
      %16 = tpu.iota {dimensions = array<i32: 1>} : vector<1x128xi32>
      %17 = vector.broadcast %5 : i32 to vector<1x128xi32>
      %18 = arith.addi %17, %15 : vector<1x128xi32>
      %c128_i32 = arith.constant 128 : i32
      %19 = vector.broadcast %c128_i32 : i32 to vector<1x128xi32>
      %20 = arith.muli %18, %19 : vector<1x128xi32>
      %21 = arith.addi %20, %16 : vector<1x128xi32>
      %c128_i32_8 = arith.constant 128 : i32
      %22 = vector.broadcast %c128_i32_8 : i32 to vector<1x128xi32>
      %23 = arith.cmpi slt, %21, %22 : vector<1x128xi32>
      %24 = vector.broadcast %6 : f32 to vector<1x128xf32>
      %25 = arith.subf %14, %24 : vector<1x128xf32>
      %cst = arith.constant 0.000000e+00 : f32
      %26 = vector.broadcast %cst : f32 to vector<1x128xf32>
      %27 = arith.select %23, %25, %26 : vector<1x128xi1>, vector<1x128xf32>
      %c0_9 = arith.constant 0 : index
      %c0_10 = arith.constant 0 : index
      %c0_11 = arith.constant 0 : index
      %28 = vector.load %arg4[%c0_9, %c0_10, %c0_11] : memref<1x8x128xf32, #tpu.memory_space<vmem>>, vector<1x1x128xf32>
      %cst_12 = arith.constant dense<0.000000e+00> : vector<128xf32>
      %29 = vector.multi_reduction <add>, %27, %cst_12 [0] : vector<1x128xf32> to vector<128xf32>
      %30 = vector.shape_cast %29 : vector<128xf32> to vector<1x128xf32>
      %31 = vector.shape_cast %30 : vector<1x128xf32> to vector<1x1x128xf32>
      %32 = arith.addf %28, %31 : vector<1x1x128xf32>
      %c0_13 = arith.constant 0 : index
      %c0_14 = arith.constant 0 : index
      %c0_15 = arith.constant 0 : index
      %33 = vector.load %arg4[%c0_13, %c0_14, %c0_15] : memref<1x8x128xf32, #tpu.memory_space<vmem>>, vector<1x1x128xf32>
      tpu.vector_store %arg4[%c0_13, %c0_14, %c0_15], %32 {strides = array<i32>} : memref<1x8x128xf32, #tpu.memory_space<vmem>>, vector<1x1x128xf32>,
      %c0_16 = arith.constant 0 : index
      %c0_17 = arith.constant 0 : index
      %c0_18 = arith.constant 0 : index
      %34 = vector.load %arg5[%c0_16, %c0_17, %c0_18] : memref<1x8x128xf32, #tpu.memory_space<vmem>>, vector<1x1x128xf32>
      %35 = arith.mulf %27, %27 : vector<1x128xf32>
      %cst_19 = arith.constant dense<0.000000e+00> : vector<128xf32>
      %36 = vector.multi_reduction <add>, %35, %cst_19 [0] : vector<1x128xf32> to vector<128xf32>
      %37 = vector.shape_cast %36 : vector<128xf32> to vector<1x128xf32>
      %38 = vector.shape_cast %37 : vector<1x128xf32> to vector<1x1x128xf32>
      %39 = arith.addf %34, %38 : vector<1x1x128xf32>
      %c0_20 = arith.constant 0 : index
      %c0_21 = arith.constant 0 : index
      %c0_22 = arith.constant 0 : index
      %40 = vector.load %arg5[%c0_20, %c0_21, %c0_22] : memref<1x8x128xf32, #tpu.memory_space<vmem>>, vector<1x1x128xf32>
      tpu.vector_store %arg5[%c0_20, %c0_21, %c0_22], %39 {strides = array<i32>} : memref<1x8x128xf32, #tpu.memory_space<vmem>>, vector<1x1x128xf32>,
    } else {
    }
    return
  }
  func.func @transform_0(%arg0: i32, %arg1: i32) -> i32 {
    %c0_i32 = arith.constant 0 : i32
    %c0_i32_0 = arith.constant 0 : i32
    return %c0_i32 : i32
  }
  func.func @transform_1(%arg0: i32, %arg1: i32) -> (i32, i32) {
    %c1_i32 = arith.constant 1 : i32
    %0 = arith.muli %arg0, %c1_i32 : i32
    %1 = arith.addi %0, %arg1 : i32
    %c0_i32 = arith.constant 0 : i32
    %2 = arith.minsi %1, %c0_i32 : i32
    %c0_i32_0 = arith.constant 0 : i32
    %c0_i32_1 = arith.constant 0 : i32
    return %2, %c0_i32_0 : i32, i32
  }
  func.func @transform_2(%arg0: i32, %arg1: i32) -> (i32, i32, i32) {
    %c0_i32 = arith.constant 0 : i32
    %c0_i32_0 = arith.constant 0 : i32
    %c0_i32_1 = arith.constant 0 : i32
    return %arg0, %c0_i32, %c0_i32_0 : i32, i32, i32
  }
  func.func @transform_3(%arg0: i32, %arg1: i32) -> (i32, i32, i32) {
    %c0_i32 = arith.constant 0 : i32
    %c0_i32_0 = arith.constant 0 : i32
    %c0_i32_1 = arith.constant 0 : i32
    return %arg0, %c0_i32, %c0_i32_0 : i32, i32, i32
  }
}

</mosaic_0001>

<bundles_post_ra>
// kernel: tpu_custom_call.1
= control target key start
LH: loop header
LB: loop body
LE: loop exit
PB: predicated region body
PF: predicated region fallthrough
CT: control target
= control target key end

     0   :  { %10 = vsyncpa [#allocation4], 0  ;;  %s226_s0 = inlined_call_operand.<no memory space> [shape: f32[1], index: 0, kind: input, shape index: {}]   ;;  %s227_s1 = inlined_call_operand.vmem [shape: f32[1,128], index: 1, kind: input, shape index: {}]   ;;  %s228_s2 = inlined_call_operand.hbm [shape: f32[1,8,128], index: 2, kind: output, shape index: {0}]   ;;  %s229_s3 = inlined_call_operand.hbm [shape: f32[1,8,128], index: 3, kind: output, shape index: {1}]  }
   0x1   :  { %v53_v0 = vld [vmem:[%s227_s1] sm:$0x1]  ;;  %v54_v1 = vstv %s226_s0 }
   0x2   :  { %11 = vsyncpa [#allocation6], 0  ;;  %v173_v2 = vmov 0.0   ;;  %v55_v3 = vsub.f32 %v53_v0, %v54_v1  ;;  %s174_s16 = smov [#allocation3]   ;;  %s175_s18 = smov [#allocation5]  }
   0x3   :  { %44 = vst [vmem:[#allocation3] sm:$0xff] %v173_v2  ;;  %45 = vst [vmem:[#allocation5] sm:$0xff] %v173_v2  ;;  %s97_s17 = sshll.u32 %s174_s16, 4  ;;  %s107_s19 = sshll.u32 %s175_s18, 4  ;;  %s98_s17 = int_to_ptr.vmem [resolvable:$true] %s97_s17  ;;  %s108_s19 = int_to_ptr.vmem [resolvable:$true] %s107_s19 }
   0x4   :  { %v61_v4 = vmul.f32 %v55_v3, %v55_v3  ;;  %s125_s1 = scalar_lea.vmem %s98_s17, 128  ;;  %p130_p1 = scmp.lt.s32.totalorder %s98_s17, %s98_s17 }
   0x5   :  { %p126_p0 = scmp.ne.s32.totalorder %s98_s17, %s125_s1  ;;  %p131_p2 = scmp.lt.s32.totalorder %s125_s1, %s125_s1 }
   0x7   :  { %p132_p3 = por %p131_p2, %p130_p1 }
   0x9   :  { %p133_p4 = pnand %p132_p3, %p126_p0 }
   0xa   :  { %v56_v5 = vld [vmem:[#allocation3] sm:$0x1]  ;;  %v60_v6 = vld [vmem:[#allocation5] sm:$0x1] }
   0xb   :  { %v58_v7 = vadd.f32 %v56_v5, %v55_v3  ;;  %v63_v8 = vadd.f32 %v61_v4, %v60_v6 }
   0xd   :  { %59 = vst [vmem:[#allocation3] sm:$0x1] %v58_v7  ;;  %64 = vst [vmem:[#allocation5] sm:$0x1] %v63_v8 }
   0xe   :  { %136 = shalt.err (!%p133_p4)
}
   0xf   :  { %s137_s21 = scalar_lea.hbm %s228_s2, 128 }
  0x10   :  { %p138_p5 = scmp.ne.s32.totalorder %s228_s2, %s137_s21  ;;  %p141_p6 = scmp.lt.u32.totalorder %s137_s21, %s228_s2 }
  0x12   :  { %p143_p7 = pnand %p141_p6, %p138_p5 }
  0x14   :  { %146 = shalt.err (!%p143_p7)
}
  0x15   :  { %100 = dma.vmem_to_hbm [thread:$0]  %s98_s17, 128, %s228_s2, [#allocation4]  }
  0x16   :  { %s147_s28 = scalar_lea.vmem %s108_s19, 128  ;;  %p152_p9 = scmp.lt.s32.totalorder %s108_s19, %s108_s19 }
  0x17   :  { %p148_p8 = scmp.ne.s32.totalorder %s108_s19, %s147_s28  ;;  %p153_p10 = scmp.lt.s32.totalorder %s147_s28, %s147_s28 }
  0x19   :  { %p154_p11 = por %p153_p10, %p152_p9 }
  0x1b   :  { %p155_p12 = pnand %p154_p11, %p148_p8 }
  0x1d   :  { %158 = shalt.err (!%p155_p12)
}
  0x1e   :  { %s159_s4 = scalar_lea.hbm %s229_s3, 128 }
  0x1f   :  { %p160_p13 = scmp.ne.s32.totalorder %s229_s3, %s159_s4  ;;  %p163_p0 = scmp.lt.u32.totalorder %s159_s4, %s229_s3 }
  0x21   :  { %p165_p1 = pnand %p163_p0, %p160_p13 }
  0x23   :  { %168 = shalt.err (!%p165_p1)
}
  0x24   :  { %110 = dma.vmem_to_hbm [thread:$0]  %s108_s19, 128, %s229_s3, [#allocation6]  }
  0x25   :  { %169 = dma.done.wait [#allocation4], 128  }
  0x26   :  { %170 = vsyncadd [#allocation4], 4294967168 }
  0x27   :  { %171 = dma.done.wait [#allocation6], 128  }
  0x28   :  { %172 = vsyncadd [#allocation6], 4294967168 }
  0x29   :  { %117 = vsyncpa [#allocation4], 1 }
  0x2a   :  { %118 = vsyncpa [#allocation6], 1 }

</bundles_post_ra>
